<compile_context>
chip_gen: v5e
topology: v5e:2x2
jax: 0.10.0
libtpu: 0.0.40
codegen_flags: <defaults>
</compile_context>

<pallas_src>
import functools

import jax
import jax.numpy as jnp
from jax.experimental import pallas as pl
from jax.experimental.pallas import tpu as pltpu

_BIG = 1e12      # only used by the pure-JAX reference (mirrors the PyTorch code)
_NEG = -1e30     # "minus infinity" for masked columns (exp underflows cleanly to 0)


def _myloss_kernel(yp_ref, yt_ref, out_ref, m_sc, sp_sc, sn_sc,
                   *, tn, n_total, mask_cols):
    # yp_ref / yt_ref: (TR, TN) native-dtype tiles; out_ref: (TR, 1) f32.
    # m_sc / sp_sc / sn_sc: (TR, 1) f32 online-logsumexp state (per row block).
    k = pl.program_id(1)

    @pl.when(k == 0)
    def _init():
        # The reference's appended 0-logit folds into the init:
        # running max = 0, both running sums = exp(0 - 0) = 1.
        m_sc[...] = jnp.zeros_like(m_sc)
        sp_sc[...] = jnp.ones_like(sp_sc)
        sn_sc[...] = jnp.ones_like(sn_sc)

    yp = yp_ref[...].astype(jnp.float32)
    yt = yt_ref[...].astype(jnp.float32)

    z = (1.0 - 2.0 * yt) * yp            # flip sign of positive-class logits

    if mask_cols:                        # static (trace-time) branch: only when tn !| N
        col = k * tn + jax.lax.broadcasted_iota(jnp.int32, z.shape, 1)
        valid = col < n_total
        z = jnp.where(valid, z, _NEG)    # exp -> 0, never the row max (max >= 0)
        yt = jnp.where(valid, yt, 0.0)

    m_prev = m_sc[...]
    m_new = jnp.maximum(m_prev, jnp.max(z, axis=-1, keepdims=True))   # (TR, 1)
    alpha = jnp.exp(m_prev - m_new)                                   # (TR, 1)

    # Shared-max logsumexp: ONE exp pass serves both branches.
    e = jnp.exp(z - m_new)                                            # (TR, TN)
    t = yt * e
    sum_t = jnp.sum(t, axis=-1, keepdims=True)
    sum_e = jnp.sum(e, axis=-1, keepdims=True)

    sp_sc[...] = alpha * sp_sc[...] + sum_t
    sn_sc[...] = alpha * sn_sc[...] + (sum_e - sum_t)   # (1-yt)*e == e - yt*e for 0/1 labels
    m_sc[...] = m_new

    @pl.when(k == pl.num_programs(1) - 1)
    def _finalize():
        out_ref[...] = 2.0 * m_sc[...] + jnp.log(sp_sc[...]) + jnp.log(sn_sc[...])


def _sublanes(itemsize):
    # native sublane packing: f32 -> 8, bf16 -> 16, int8/fp8 -> 32
    return max(8, 32 // max(1, min(int(itemsize), 4)))


def my_loss(y_pred, y_true, *, block_rows=None, block_cols=None):
    """y_pred, y_true: [B, C, S, S] -> scalar loss (float32).

    y_true may be any dtype exactly representing 0/1 (bf16/int8 recommended to
    cut HBM read traffic); the f32 upcast happens in-register inside the kernel.
    """
    B, C, S1, S2 = y_pred.shape
    R, N = B * C, S1 * S2

    # Reshape only (no copy, no dtype change): HBM traffic stays at input width.
    yp = y_pred.reshape(R, N)
    yt = y_true.reshape(R, N)

    pb = jnp.dtype(yp.dtype).itemsize
    tb = jnp.dtype(yt.dtype).itemsize
    sub = max(_sublanes(pb), _sublanes(tb))

    # Generation-aware VMEM budgets: v5e/v6e have 128 MiB VMEM per TC, v7x 64 MiB.
    try:
        info = pltpu.get_tpu_info()
        vmem_cap = int(getattr(info, "vmem_capacity_bytes", 64 * 1024 * 1024))
    except Exception:
        vmem_cap = 64 * 1024 * 1024
    if vmem_cap >= 96 * 1024 * 1024:          # v5e / v6e
        budget = 40 * 1024 * 1024             # per-step footprint incl. f32 temps
        vmem_limit = 80 * 1024 * 1024
    else:                                     # v7x (or unknown): stay well under 64 MiB
        budget = 24 * 1024 * 1024
        vmem_limit = 48 * 1024 * 1024

    # Per-element per-step bytes: double-buffered native inputs + ~4 f32 temporaries.
    per_elem = 2 * (pb + tb) + 16
    max_elems = max(budget // per_elem, 8 * 128)

    # ---- class/reduction axis tile (lanes; last grid axis, "arbitrary") ----
    if block_cols is not None:
        tn = int(block_cols)
    elif 8 * N <= max_elems:
        tn = N                                # whole reduction axis resident (1 k-step)
    else:
        tn_cap = max(128, (max_elems // 8) // 128 * 128)
        tn = tn_cap
        for cand in range(tn_cap, 127, -128):  # prefer a divisor of N (no masked tail)
            if N % cand == 0:
                tn = cand
                break
    if tn >= N:
        tn = N
    else:
        tn = max(128, (tn // 128) * 128)      # lane-tile must be a multiple of 128
    n_blocks = -(-N // tn)
    mask_cols = (N % tn) != 0

    # ---- row axis tile (sublanes; "parallel" grid axis) ----
    if R <= sub:
        tr = R                                # single block equal to the full dim
    else:
        if block_rows is not None:
            tr = max(sub, (int(block_rows) // sub) * sub)
        else:
            tr = max(sub, (max_elems // tn) // sub * sub)
        tr = min(tr, -(-R // sub) * sub)
        # Keep >= min(4, #possible blocks) row blocks so v7x's two TensorCores
        # both get work (v5e/v6e are single-TC; extra steps are cheap there).
        target = min(4, -(-R // sub))
        tr = min(tr, max(sub, (R // target) // sub * sub))
    r_blocks = -(-R // tr)

    kernel = functools.partial(_myloss_kernel, tn=tn, n_total=N, mask_cols=mask_cols)

    per_row = pl.pallas_call(
        kernel,
        out_shape=jax.ShapeDtypeStruct((R, 1), jnp.float32),
        grid=(r_blocks, n_blocks),
        in_specs=[
            pl.BlockSpec((tr, tn), lambda i, k: (i, k)),
            pl.BlockSpec((tr, tn), lambda i, k: (i, k)),
        ],
        out_specs=pl.BlockSpec((tr, 1), lambda i, k: (i, 0)),
        scratch_shapes=[
            pltpu.VMEM((tr, 1), jnp.float32),   # running max
            pltpu.VMEM((tr, 1), jnp.float32),   # running positive-branch sum
            pltpu.VMEM((tr, 1), jnp.float32),   # running negative-branch sum
        ],
        compiler_params=pltpu.CompilerParams(
            dimension_semantics=("parallel", "arbitrary"),
            vmem_limit_bytes=vmem_limit,
        ),
    )(yp, yt)

    # Tiny final reduction over exactly R rows (no padding was ever created).
    return jnp.mean(per_row)


def _reference(y_pred, y_true):
    # Pure-JAX reference mirroring the PyTorch forward exactly.
    R = y_pred.shape[0] * y_pred.shape[1]
    yp = y_pred.reshape(R, -1).astype(jnp.float32)
    yt = y_true.reshape(R, -1).astype(jnp.float32)
    z = (1.0 - 2.0 * yt) * yp
    z_pos = z - (1.0 - yt) * _BIG
    z_neg = z - yt * _BIG
    zeros = jnp.zeros((R, 1), jnp.float32)
    pos = jax.nn.logsumexp(jnp.concatenate([z_pos, zeros], axis=-1), axis=-1)
    neg = jax.nn.logsumexp(jnp.concatenate([z_neg, zeros], axis=-1), axis=-1)
    return jnp.mean(pos + neg)


if __name__ == "__main__":
    key = jax.random.PRNGKey(0)
    ks = jax.random.split(key, 6)

    # Case 1: module-spec shapes, single-block path. f32 logits, narrow bf16 labels.
    B, C, S = 2, 4, 8
    y_pred = jax.random.normal(ks[0], (B, C, S, S), dtype=jnp.float32)
    y_true = (jax.random.uniform(ks[1], (B, C, S, S)) > 0.9).astype(jnp.bfloat16)
    loss = jax.block_until_ready(my_loss(y_pred, y_true))
    ref = jax.block_until_ready(_reference(y_pred, y_true))
    assert jnp.allclose(loss, ref, rtol=1e-5, atol=1e-5), (loss, ref)

    # Case 2: multi-row-block path with a masked row tail (R=40, tr=16 -> 3 row
    # blocks, NO jnp.pad). bf16 logits + bf16 labels.
    B2, C2, S2 = 5, 8, 8
    y_pred2 = jax.random.normal(ks[2], (B2, C2, S2, S2), dtype=jnp.bfloat16)
    y_true2 = (jax.random.uniform(ks[3], (B2, C2, S2, S2)) > 0.9).astype(jnp.bfloat16)
    loss2 = jax.block_until_ready(my_loss(y_pred2, y_true2, block_rows=16))
    ref2 = jax.block_until_ready(_reference(y_pred2, y_true2))
    assert jnp.allclose(loss2, ref2, rtol=1e-5, atol=1e-5), (loss2, ref2)

    # Case 3: reduction-axis tiling with online logsumexp and a masked column
    # tail (N=400, tn=128 -> 4 k-steps, only 16 valid lanes in the last one).
    B3, C3, S3 = 2, 2, 20
    y_pred3 = jax.random.normal(ks[4], (B3, C3, S3, S3), dtype=jnp.float32)
    y_true3 = (jax.random.uniform(ks[5], (B3, C3, S3, S3)) > 0.9).astype(jnp.float32)
    loss3 = jax.block_until_ready(my_loss(y_pred3, y_true3, block_cols=128))
    ref3 = jax.block_until_ready(_reference(y_pred3, y_true3))
    assert jnp.allclose(loss3, ref3, rtol=1e-5, atol=1e-5), (loss3, ref3)

    print("KERNEL_OK")
</pallas_src>

<mosaic_0001>
module attributes {stable_mosaic.version = 11 : i64} {
  func.func @_myloss_kernel(%arg0: i32, %arg1: i32, %arg2: memref<8x64xf32, #tpu.memory_space<vmem>>, %arg3: memref<8x64xbf16, #tpu.memory_space<vmem>>, %arg4: memref<8x1xf32, #tpu.memory_space<vmem>>, %arg5: memref<8x1xf32, #tpu.memory_space<vmem>>, %arg6: memref<8x1xf32, #tpu.memory_space<vmem>>, %arg7: memref<8x1xf32, #tpu.memory_space<vmem>>) attributes {dimension_semantics = [#tpu.dimension_semantics<parallel>, #tpu.dimension_semantics<arbitrary>], iteration_bounds = array<i64: 1, 1>, scalar_prefetch = 0 : i64, scratch_operands = 3 : i64, tpu.core_type = #tpu.core_type<tc>, window_params = [{transform_indices = @transform_0, window_bounds = array<i64: 8, 64>}, {transform_indices = @transform_1, window_bounds = array<i64: 8, 64>}, {transform_indices = @transform_2, window_bounds = array<i64: 8, 1>}]} {
    %c0_i32 = arith.constant 0 : i32
    %0 = arith.cmpi eq, %arg1, %c0_i32 : i32
    %1 = arith.extui %0 : i1 to i32
    %c0_i32_0 = arith.constant 0 : i32
    %2 = arith.cmpi ne, %1, %c0_i32_0 : i32
    scf.if %2 {
      %cst_22 = arith.constant 0.000000e+00 : f32
      %38 = vector.broadcast %cst_22 : f32 to vector<8x1xf32>
      %c0_23 = arith.constant 0 : index
      %c0_24 = arith.constant 0 : index
      %39 = vector.load %arg5[%c0_23, %c0_24] : memref<8x1xf32, #tpu.memory_space<vmem>>, vector<8x1xf32>
      tpu.vector_store %arg5[%c0_23, %c0_24], %38 {strides = array<i32>} : memref<8x1xf32, #tpu.memory_space<vmem>>, vector<8x1xf32>,
      %cst_25 = arith.constant 1.000000e+00 : f32
      %40 = vector.broadcast %cst_25 : f32 to vector<8x1xf32>
      %c0_26 = arith.constant 0 : index
      %c0_27 = arith.constant 0 : index
      %41 = vector.load %arg6[%c0_26, %c0_27] : memref<8x1xf32, #tpu.memory_space<vmem>>, vector<8x1xf32>
      tpu.vector_store %arg6[%c0_26, %c0_27], %40 {strides = array<i32>} : memref<8x1xf32, #tpu.memory_space<vmem>>, vector<8x1xf32>,
      %cst_28 = arith.constant 1.000000e+00 : f32
      %42 = vector.broadcast %cst_28 : f32 to vector<8x1xf32>
      %c0_29 = arith.constant 0 : index
      %c0_30 = arith.constant 0 : index
      %43 = vector.load %arg7[%c0_29, %c0_30] : memref<8x1xf32, #tpu.memory_space<vmem>>, vector<8x1xf32>
      tpu.vector_store %arg7[%c0_29, %c0_30], %42 {strides = array<i32>} : memref<8x1xf32, #tpu.memory_space<vmem>>, vector<8x1xf32>,
    } else {
    }
    %c0 = arith.constant 0 : index
    %c0_1 = arith.constant 0 : index
    %3 = vector.load %arg2[%c0, %c0_1] : memref<8x64xf32, #tpu.memory_space<vmem>>, vector<8x64xf32>
    %c0_2 = arith.constant 0 : index
    %c0_3 = arith.constant 0 : index
    %4 = vector.load %arg3[%c0_2, %c0_3] : memref<8x64xbf16, #tpu.memory_space<vmem>>, vector<8x64xbf16>
    %5 = arith.extf %4 : vector<8x64xbf16> to vector<8x64xf32>
    %cst = arith.constant 2.000000e+00 : f32
    %6 = vector.broadcast %cst : f32 to vector<8x64xf32>
    %7 = arith.mulf %6, %5 : vector<8x64xf32>
    %cst_4 = arith.constant 1.000000e+00 : f32
    %8 = vector.broadcast %cst_4 : f32 to vector<8x64xf32>
    %9 = arith.subf %8, %7 : vector<8x64xf32>
    %10 = arith.mulf %9, %3 : vector<8x64xf32>
    %c0_5 = arith.constant 0 : index
    %c0_6 = arith.constant 0 : index
    %11 = vector.load %arg5[%c0_5, %c0_6] : memref<8x1xf32, #tpu.memory_space<vmem>>, vector<8x1xf32>
    %cst_7 = arith.constant dense<0xFF800000> : vector<8xf32>
    %12 = vector.multi_reduction <maximumf>, %10, %cst_7 [1] : vector<8x64xf32> to vector<8xf32>
    %13 = vector.shape_cast %12 : vector<8xf32> to vector<8x1xf32>
    %14 = arith.maximumf %11, %13 : vector<8x1xf32>
    %15 = arith.subf %11, %14 : vector<8x1xf32>
    %16 = math.exp %15 : vector<8x1xf32>
    %17 = vector.broadcast %14 : vector<8x1xf32> to vector<8x64xf32>
    %18 = arith.subf %10, %17 : vector<8x64xf32>
    %19 = math.exp %18 : vector<8x64xf32>
    %20 = arith.mulf %5, %19 : vector<8x64xf32>
    %cst_8 = arith.constant dense<0.000000e+00> : vector<8xf32>
    %21 = vector.multi_reduction <add>, %20, %cst_8 [1] : vector<8x64xf32> to vector<8xf32>
    %22 = vector.shape_cast %21 : vector<8xf32> to vector<8x1xf32>
    %cst_9 = arith.constant dense<0.000000e+00> : vector<8xf32>
    %23 = vector.multi_reduction <add>, %19, %cst_9 [1] : vector<8x64xf32> to vector<8xf32>
    %24 = vector.shape_cast %23 : vector<8xf32> to vector<8x1xf32>
    %c0_10 = arith.constant 0 : index
    %c0_11 = arith.constant 0 : index
    %25 = vector.load %arg6[%c0_10, %c0_11] : memref<8x1xf32, #tpu.memory_space<vmem>>, vector<8x1xf32>
    %26 = arith.mulf %16, %25 : vector<8x1xf32>
    %27 = arith.addf %26, %22 : vector<8x1xf32>
    %c0_12 = arith.constant 0 : index
    %c0_13 = arith.constant 0 : index
    %28 = vector.load %arg6[%c0_12, %c0_13] : memref<8x1xf32, #tpu.memory_space<vmem>>, vector<8x1xf32>
    tpu.vector_store %arg6[%c0_12, %c0_13], %27 {strides = array<i32>} : memref<8x1xf32, #tpu.memory_space<vmem>>, vector<8x1xf32>,
    %c0_14 = arith.constant 0 : index
    %c0_15 = arith.constant 0 : index
    %29 = vector.load %arg7[%c0_14, %c0_15] : memref<8x1xf32, #tpu.memory_space<vmem>>, vector<8x1xf32>
    %30 = arith.mulf %16, %29 : vector<8x1xf32>
    %31 = arith.subf %24, %22 : vector<8x1xf32>
    %32 = arith.addf %30, %31 : vector<8x1xf32>
    %c0_16 = arith.constant 0 : index
    %c0_17 = arith.constant 0 : index
    %33 = vector.load %arg7[%c0_16, %c0_17] : memref<8x1xf32, #tpu.memory_space<vmem>>, vector<8x1xf32>
    tpu.vector_store %arg7[%c0_16, %c0_17], %32 {strides = array<i32>} : memref<8x1xf32, #tpu.memory_space<vmem>>, vector<8x1xf32>,
    %c0_18 = arith.constant 0 : index
    %c0_19 = arith.constant 0 : index
    %34 = vector.load %arg5[%c0_18, %c0_19] : memref<8x1xf32, #tpu.memory_space<vmem>>, vector<8x1xf32>
    tpu.vector_store %arg5[%c0_18, %c0_19], %14 {strides = array<i32>} : memref<8x1xf32, #tpu.memory_space<vmem>>, vector<8x1xf32>,
    %c0_i32_20 = arith.constant 0 : i32
    %35 = arith.cmpi eq, %arg1, %c0_i32_20 : i32
    %36 = arith.extui %35 : i1 to i32
    %c0_i32_21 = arith.constant 0 : i32
    %37 = arith.cmpi ne, %36, %c0_i32_21 : i32
    scf.if %37 {
      %c0_22 = arith.constant 0 : index
      %c0_23 = arith.constant 0 : index
      %38 = vector.load %arg5[%c0_22, %c0_23] : memref<8x1xf32, #tpu.memory_space<vmem>>, vector<8x1xf32>
      %cst_24 = arith.constant 2.000000e+00 : f32
      %39 = vector.broadcast %cst_24 : f32 to vector<8x1xf32>
      %40 = arith.mulf %39, %38 : vector<8x1xf32>
      %c0_25 = arith.constant 0 : index
      %c0_26 = arith.constant 0 : index
      %41 = vector.load %arg6[%c0_25, %c0_26] : memref<8x1xf32, #tpu.memory_space<vmem>>, vector<8x1xf32>
      %42 = math.log %41 : vector<8x1xf32>
      %43 = arith.addf %40, %42 : vector<8x1xf32>
      %c0_27 = arith.constant 0 : index
      %c0_28 = arith.constant 0 : index
      %44 = vector.load %arg7[%c0_27, %c0_28] : memref<8x1xf32, #tpu.memory_space<vmem>>, vector<8x1xf32>
      %45 = math.log %44 : vector<8x1xf32>
      %46 = arith.addf %43, %45 : vector<8x1xf32>
      %c0_29 = arith.constant 0 : index
      %c0_30 = arith.constant 0 : index
      %47 = vector.load %arg4[%c0_29, %c0_30] : memref<8x1xf32, #tpu.memory_space<vmem>>, vector<8x1xf32>
      tpu.vector_store %arg4[%c0_29, %c0_30], %46 {strides = array<i32>} : memref<8x1xf32, #tpu.memory_space<vmem>>, vector<8x1xf32>,
    } else {
    }
    return
  }
  func.func @transform_0(%arg0: i32, %arg1: i32) -> (i32, i32) {
    %c0_i32 = arith.constant 0 : i32
    return %arg0, %arg1 : i32, i32
  }
  func.func @transform_1(%arg0: i32, %arg1: i32) -> (i32, i32) {
    %c0_i32 = arith.constant 0 : i32
    return %arg0, %arg1 : i32, i32
  }
  func.func @transform_2(%arg0: i32, %arg1: i32) -> (i32, i32) {
    %c0_i32 = arith.constant 0 : i32
    %c0_i32_0 = arith.constant 0 : i32
    return %arg0, %c0_i32 : i32, i32
  }
}

</mosaic_0001>

<bundles_post_ra>
// kernel: tpu_custom_call.1
= control target key start
LH: loop header
LB: loop body
LE: loop exit
PB: predicated region body
PF: predicated region fallthrough
CT: control target
= control target key end

     0   :  { %7 = vsyncpa [#allocation6], 0  ;;  %s213_s0 = inlined_call_operand.hbm [shape: f32[8,64], index: 0, kind: input, shape index: {}]   ;;  %s214_s1 = inlined_call_operand.hbm [shape: bf16[8,64], index: 1, kind: input, shape index: {}]   ;;  %s215_s2 = inlined_call_operand.vmem [shape: f32[8,1], index: 2, kind: output, shape index: {}]  }
   0x1   :  { %s14_s11 = sshll.u32 %s213_s0, 4  ;;  %s15_s11 = int_to_ptr.hbm [resolvable:$true] %s14_s11 }
   0x2   :  { %8 = vsyncpa [#allocation8], 0  ;;  %s174_s12 = smov [#allocation5]   ;;  %s25_s16 = sshll.u32 %s214_s1, 4  ;;  %s26_s16 = int_to_ptr.hbm [resolvable:$true] %s25_s16 }
   0x3   :  { %s16_s13 = sshll.u32 %s174_s12, 4  ;;  %s175_s17 = smov [#allocation7]   ;;  %s17_s13 = int_to_ptr.vmem [resolvable:$true] %s16_s13 }
   0x4   :  { %19 = dma.hbm_to_vmem [thread:$0]  %s15_s11, 128, %s17_s13, [#allocation6]  }
   0x5   :  { %s27_s18 = sshll.u32 %s175_s17, 4  ;;  %s28_s18 = int_to_ptr.vmem [resolvable:$true] %s27_s18 }
   0x6   :  { %30 = dma.hbm_to_vmem [thread:$0]  %s26_s16, 64, %s28_s18, [#allocation8]  }
   0x7   :  { %170 = dma.done.wait [#allocation6], 128  }
   0x8   :  { %171 = vsyncadd [#allocation6], 4294967168 }
   0x9   :  { %172 = dma.done.wait [#allocation8], 64  }
   0xa   :  { %173 = vsyncadd [#allocation8], 4294967232  ;;  %vm43_vm0 = vcmask 7168   ;;  %v176_v0 = vmov 0.0   ;;  %v48_v1 = vld [vmem:[#allocation7] sm:$0xf] }
   0xb   :  { %44 = vst.msk [vmem:[#allocation2] sm:$0xff] %vm43_vm0, %v176_v0  ;;  %v49_v2 = vunpack.c.l.bf16 %v48_v1  ;;  %v47_v4 = vld [vmem:[#allocation5] sm:$0xff]  ;;  %vm54_vm1 = vcmask 523264   ;;  %v177_v8 = vmov 0   ;;  %v178_v9 = vmov 1.0  }
   0xc   :  { %113 = vset.pattern.permute.xlu0 %v177_v8  ;;  %45 = vst.msk [vmem:[#allocation3] sm:$0xff] %vm43_vm0, %v178_v9 }
   0xd   :  { %v50_v3 = vmul.f32 2.0, %v49_v2  ;;  %46 = vst.msk [vmem:[#allocation4] sm:$0xff] %vm43_vm0, %v178_v9 }
   0xf   :  { %v51_v5 = vsub.f32 1.0, %v50_v3 }
  0x11   :  { %v52_v6 = vmul.f32 %v51_v5, %v47_v4 }
  0x12   :  { %v53_v10 = vld [vmem:[#allocation2] sm:$0xff] }
  0x13   :  { %v55_v7 = vsel %vm54_vm1, %v52_v6, -inf  ;;  %v77_v23 = vld [vmem:[#allocation3] sm:$0xff] }
  0x14   :  { %56 = vmax.xlane.f32.xlu0 %v55_v7  ;;  %v82_v27 = vld [vmem:[#allocation4] sm:$0xff] }
  0x87   :  { %v57_v11 = vpop.xlane.xlu0 %56 }
  0x88   :  { %v58_v12 = vmax.f32 %v53_v10, %v57_v11 }
  0x8a   :  { %v59_v13 = vsub.f32 %v53_v10, %v58_v12  ;;  %87 = vst.msk [vmem:[#allocation2] sm:$0xff] %vm43_vm0, %v58_v12  ;;  %64 = vperm.xlu0 %113, %v58_v12  }
  0x8c   :  { %v60_v21 = vmul.f32 1.442695, %v59_v13 }
  0x91   :  { %v91_v35 = vld [vmem:[#allocation2] sm:$0xff] }
  0x92   :  { %v92_v37 = vmul.f32 2.0, %v91_v35 }
  0xfc   :  { %v65_v14 = vpop.permute.xlu0 %64 }
  0xfd   :  { %v67_v15 = vsub.f32 %v52_v6, %v65_v14 }
  0xff   :  { %v68_v16 = vmul.f32 1.442695, %v67_v15 }
 0x101   :  { %114 = vpow2.f32 %v68_v16 }
 0x102   :  { %116 = vpow2.f32 %v60_v21 }
 0x107   :  { %v115_v17 = vpop.eup %114 }
 0x108   :  { %v70_v18 = vmul.f32 %v115_v17, %v49_v2  ;;  %v74_v20 = vsel %vm54_vm1, %v115_v17, 0.0  ;;  %v117_v22 = vpop.eup %116 }
 0x109   :  { %v78_v24 = vmul.f32 %v117_v22, %v77_v23  ;;  %v83_v29 = vmul.f32 %v117_v22, %v82_v27 }
 0x10a   :  { %v71_v19 = vsel %vm54_vm1, %v70_v18, 0.0 }
 0x10b   :  { %72 = vadd.xlane.f32.xlu1 %v71_v19 }
 0x113   :  { %75 = vadd.xlane.f32.xlu1 %v74_v20 }
 0x17e   :  { %v73_v25 = vpop.xlane.xlu1 %72 }
 0x17f   :  { %v79_v26 = vadd.f32 %v78_v24, %v73_v25 }
 0x181   :  { %81 = vst.msk [vmem:[#allocation3] sm:$0xff] %vm43_vm0, %v79_v26 }
 0x186   :  { %v76_v28 = vpop.xlane.xlu1 %75 }
 0x187   :  { %v84_v30 = vsub.f32 %v76_v28, %v73_v25 }
 0x188   :  { %v93_v32 = vld [vmem:[#allocation3] sm:$0xff] }
 0x189   :  { %v85_v31 = vadd.f32 %v84_v30, %v83_v29  ;;  %118 = vlog2.f32 %v93_v32 }
 0x18b   :  { %86 = vst.msk [vmem:[#allocation4] sm:$0xff] %vm43_vm0, %v85_v31 }
 0x18f   :  { %v119_v34 = vpop.eup %118 }
 0x190   :  { %v95_v36 = vmul.f32 0.6931472, %v119_v34 }
 0x192   :  { %v97_v33 = vld [vmem:[#allocation4] sm:$0xff]  ;;  %v96_v39 = vadd.f32 %v95_v36, %v92_v37 }
 0x193   :  { %120 = vlog2.f32 %v97_v33 }
 0x199   :  { %v121_v38 = vpop.eup %120 }
 0x19a   :  { %v99_v40 = vmul.f32 0.6931472, %v121_v38 }
 0x19c   :  { %v100_v41 = vadd.f32 %v99_v40, %v96_v39 }
 0x19e   :  { %101 = vst.msk [vmem:[%s215_s2] sm:$0xff] %vm43_vm0, %v100_v41 }
 0x19f   :  { %106 = vsyncpa [#allocation6], 1 }
 0x1a0   :  { %107 = vsyncpa [#allocation8], 1 }

</bundles_post_ra>
